<compile_context>
chip_gen: v6e
topology: v6e:2x2x1
jax: 0.10.0
libtpu: 0.0.40
codegen_flags: <defaults>
</compile_context>

<pallas_src>
import functools

import jax
import jax.numpy as jnp
from jax.experimental import pallas as pl
from jax.experimental.pallas import tpu as pltpu


def _round_up(x, m):
    return (x + m - 1) // m * m


# ----------------------------- Pallas kernel ------------------------------ #

def _fused_mlp_kernel(x_ref, w_ref, b_ref, o_ref, *, relu_flags):
    """Whole MLP stack fused: h_{l+1} = [relu](h_l @ W_l + b_l), unrolled.

    x_ref: [rows, cin]  f32   (one row tile of node features, real width)
    w_ref: [L, C, C]    bf16  (all folded layer weights, VMEM-resident)
    b_ref: [L, 1, C]    f32   (all folded biases)
    o_ref: [rows, cout] f32   (real-width output tile; no lane padding stored)
    """
    n_layers = len(relu_flags)
    cin = x_ref.shape[-1]
    cout = o_ref.shape[-1]

    h = x_ref[...].astype(jnp.bfloat16)                 # bf16 [rows, cin]
    for l, relu in enumerate(relu_flags):               # static unroll (L small)
        if l == 0:
            w = w_ref[l, :cin, :]                       # true K for layer 0
        else:
            w = w_ref[l]
        y = jnp.dot(h, w, preferred_element_type=jnp.float32)
        y = y + b_ref[l]
        if relu:
            y = jnp.maximum(y, 0.0)
        if l + 1 < n_layers:
            h = y.astype(jnp.bfloat16)                  # bf16 feed to next MXU op
        else:
            # Only the real output channels leave the kernel.
            o_ref[...] = y[:, :cout].astype(o_ref.dtype)


def fused_mlp_forward(x, w_stacked, b_stacked, relu_flags, out_channel,
                      *, row_tile=1024):
    """Run the fused MLP stack.

    x:          [N, cin] f32 node features (unpadded)
    w_stacked:  [L, C, C] bf16 folded+padded weights (C = lane-padded width)
    b_stacked:  [L, 1, C] f32 folded+padded biases
    Returns [N, out_channel] f32.
    """
    n, cin = x.shape
    num_layers, C, _ = w_stacked.shape

    # Row tile: multiple of 8 sublanes; cap so the grid has >= 2 steps when N
    # allows it (v7x: lets the "parallel" axis use both TensorCores).
    row_tile = max(8, min(row_tile, _round_up(max(n // 2, 8), 8)))
    n_pad = _round_up(n, row_tile)
    if n_pad != n:
        # Only row padding (rare, < row_tile zero rows); no lane padding.
        x = jnp.pad(x, ((0, n_pad - n), (0, 0)))

    kernel = functools.partial(_fused_mlp_kernel, relu_flags=tuple(relu_flags))

    out_p = pl.pallas_call(
        kernel,
        out_shape=jax.ShapeDtypeStruct((n_pad, out_channel), jnp.float32),
        grid_spec=pltpu.PrefetchScalarGridSpec(
            num_scalar_prefetch=0,
            grid=(n_pad // row_tile,),
            in_specs=[
                # Real-width input block (last dim == full array dim -> legal).
                pl.BlockSpec((row_tile, cin), lambda i: (i, 0)),
                # Weights / biases: constant index_map -> fetched once.
                pl.BlockSpec((num_layers, C, C), lambda i: (0, 0, 0)),
                pl.BlockSpec((num_layers, 1, C), lambda i: (0, 0, 0)),
            ],
            # Real-width output block: minimal writeback, no wrapper slice.
            out_specs=pl.BlockSpec((row_tile, out_channel), lambda i: (i, 0)),
        ),
        compiler_params=pltpu.CompilerParams(
            dimension_semantics=("parallel",),
            vmem_limit_bytes=32 * 1024 * 1024,
        ),
    )(x, w_stacked, b_stacked)

    return out_p if n_pad == n else out_p[:n]


# --------------------------- Parameter building --------------------------- #

def _make_layer_params(key, cin, cout, with_bn):
    """Deterministic Linear (+ eval-mode BatchNorm1d) parameters."""
    kw, kb, km, kv = jax.random.split(key, 4)
    lim = 1.0 / jnp.sqrt(jnp.float32(cin))             # PyTorch Linear init
    w = jax.random.uniform(kw, (cin, cout), jnp.float32, -lim, lim)
    b = jax.random.uniform(kb, (1, cout), jnp.float32, -lim, lim)
    if with_bn:
        eps = 1e-5
        gamma = jnp.ones((1, cout), jnp.float32)
        beta = jnp.zeros((1, cout), jnp.float32)
        running_mean = 0.1 * jax.random.normal(km, (1, cout), jnp.float32)
        running_var = 1.0 + 0.1 * jax.random.uniform(kv, (1, cout), jnp.float32)
        scale = gamma / jnp.sqrt(running_var + eps)
        shift = beta - running_mean * scale
    else:
        scale = jnp.ones((1, cout), jnp.float32)
        shift = jnp.zeros((1, cout), jnp.float32)
    return dict(w=w, b=b, scale=scale, shift=shift)


def build_gnn_node_params(key, in_channel, hidden_channel, out_channel,
                          num_hidden):
    """One GNN_Node = MLP: in->hidden (+BN+ReLU), num_hidden x hidden->hidden
    (+BN+ReLU), hidden->out (no activation)."""
    layers = []
    dims = [(in_channel, hidden_channel)]
    dims += [(hidden_channel, hidden_channel)] * num_hidden
    keys = jax.random.split(key, len(dims) + 1)
    for k, (ci, co) in zip(keys[:-1], dims):
        p = _make_layer_params(k, ci, co, with_bn=True)
        p["relu"] = True
        layers.append(p)
    p = _make_layer_params(keys[-1], hidden_channel, out_channel, with_bn=False)
    p["relu"] = False
    layers.append(p)
    return layers


def build_buildnet_dec_node_params(key, channel_meta):
    """channel_meta: list of dicts with in/hidden/out/num_hidden per GNN_Node."""
    modules = []
    keys = jax.random.split(key, len(channel_meta))
    for k, meta in zip(keys, channel_meta):
        modules.append(build_gnn_node_params(
            k, meta["in_channel"], meta["hidden_channel"],
            meta["out_channel"], meta["num_hidden"]))
    return modules


def fold_and_pack_params(params, lane=128):
    """Fold eval-mode BN into W/b, zero-pad channels to `lane`, stack layers."""
    layers = [layer for module in params for layer in module]
    max_c = max(max(layer["w"].shape) for layer in layers)
    C = _round_up(max_c, lane)
    L = len(layers)
    w_stacked = jnp.zeros((L, C, C), jnp.float32)
    b_stacked = jnp.zeros((L, 1, C), jnp.float32)
    relu_flags = []
    for l, layer in enumerate(layers):
        w_fold = layer["w"] * layer["scale"]                   # scale per out-col
        b_fold = layer["b"] * layer["scale"] + layer["shift"]
        ci, co = w_fold.shape
        w_stacked = w_stacked.at[l, :ci, :co].set(w_fold)
        b_stacked = b_stacked.at[l, :, :co].set(b_fold)
        relu_flags.append(bool(layer["relu"]))
    return w_stacked.astype(jnp.bfloat16), b_stacked, tuple(relu_flags)


# ------------------------------- References -------------------------------- #

def reference_forward_module(params, x):
    """Pure-JAX f32 reference mirroring the PyTorch module (eval-mode BN)."""
    h = x
    for module in params:
        for layer in module:
            y = h @ layer["w"] + layer["b"]
            y = y * layer["scale"] + layer["shift"]
            if layer["relu"]:
                y = jnp.maximum(y, 0.0)
            h = y
    return h


def reference_forward_folded(x, w_stacked, b_stacked, relu_flags, out_channel):
    """Pure-JAX reference doing exactly the kernel's math (bf16 ops, f32 acc)."""
    cin = x.shape[1]
    L = len(relu_flags)
    h = x.astype(jnp.bfloat16)
    for l, relu in enumerate(relu_flags):
        w = w_stacked[l, :cin, :] if l == 0 else w_stacked[l]
        y = jnp.dot(h, w, preferred_element_type=jnp.float32) + b_stacked[l]
        if relu:
            y = jnp.maximum(y, 0.0)
        h = y.astype(jnp.bfloat16) if l + 1 < L else y
    return h[:, :out_channel]


# ---------------------------------- Main ----------------------------------- #

if __name__ == "__main__":
    key = jax.random.PRNGKey(0)
    k_params, k_x = jax.random.split(key)

    # modelmeta.mlp_channels equivalent: two GNN_Node updates.
    channel_meta = [
        dict(in_channel=32, hidden_channel=64, out_channel=64, num_hidden=2),
        dict(in_channel=64, hidden_channel=64, out_channel=16, num_hidden=1),
    ]
    params = build_buildnet_dec_node_params(k_params, channel_meta)
    w_stacked, b_stacked, relu_flags = fold_and_pack_params(params)

    # input_features: [num_nodes, in_channel]
    n_nodes = 128
    cin = channel_meta[0]["in_channel"]
    cout = channel_meta[-1]["out_channel"]
    x = jax.random.normal(k_x, (n_nodes, cin), jnp.float32)

    out = fused_mlp_forward(x, w_stacked, b_stacked, relu_flags, cout,
                            row_tile=1024)
    out = jax.block_until_ready(out)
    assert out.shape == (n_nodes, cout)

    # Exact-math check (same bf16 operands / f32 accumulation as the kernel).
    ref_same = reference_forward_folded(x, w_stacked, b_stacked, relu_flags,
                                        cout)
    assert jnp.allclose(out, ref_same, atol=2e-3, rtol=2e-3), \
        "mismatch vs folded bf16 reference"

    # Semantic check vs the unfolded f32 module (loose: bf16 weight rounding).
    ref_module = reference_forward_module(params, x)
    assert jnp.allclose(out, ref_module, atol=0.2, rtol=0.2), \
        "mismatch vs f32 module reference"

    print("KERNEL_OK")
</pallas_src>

<mosaic_0001>
module attributes {stable_mosaic.version = 11 : i64} {
  func.func @_fused_mlp_kernel(%arg0: i32, %arg1: memref<64x32xf32, #tpu.memory_space<vmem>>, %arg2: memref<7x128x128xbf16, #tpu.memory_space<vmem>>, %arg3: memref<7x1x128xf32, #tpu.memory_space<vmem>>, %arg4: memref<64x16xf32, #tpu.memory_space<vmem>>) attributes {dimension_semantics = [#tpu.dimension_semantics<parallel>], iteration_bounds = array<i64: 2>, scalar_prefetch = 0 : i64, scratch_operands = 0 : i64, tpu.core_type = #tpu.core_type<tc>, window_params = [{transform_indices = @transform_0, window_bounds = array<i64: 64, 32>}, {pipeline_mode = #tpu.pipeline_mode<synchronous>, transform_indices = @transform_1, window_bounds = array<i64: 7, 128, 128>}, {pipeline_mode = #tpu.pipeline_mode<synchronous>, transform_indices = @transform_2, window_bounds = array<i64: 7, 1, 128>}, {transform_indices = @transform_3, window_bounds = array<i64: 64, 16>}]} {
    %c0 = arith.constant 0 : index
    %c0_0 = arith.constant 0 : index
    %0 = vector.load %arg1[%c0, %c0_0] : memref<64x32xf32, #tpu.memory_space<vmem>>, vector<64x32xf32>
    %1 = arith.truncf %0 : vector<64x32xf32> to vector<64x32xbf16>
    %c0_1 = arith.constant 0 : index
    %c0_2 = arith.constant 0 : index
    %c0_3 = arith.constant 0 : index
    %2 = vector.load %arg2[%c0_1, %c0_2, %c0_3] : memref<7x128x128xbf16, #tpu.memory_space<vmem>>, vector<1x32x128xbf16>
    %3 = vector.shape_cast %2 : vector<1x32x128xbf16> to vector<32x128xbf16>
    %cst = arith.constant dense<0.000000e+00> : vector<64x128xf32>
    %4 = tpu.matmul %1, %3, %cst {dimension_numbers = #tpu.dot_dimension_numbers<[1], [0], [0], [1], [0, 0, 1, 1], [], []>} : vector<64x32xbf16>, vector<32x128xbf16>, vector<64x128xf32> -> vector<64x128xf32>
    %c0_4 = arith.constant 0 : index
    %c0_5 = arith.constant 0 : index
    %c0_6 = arith.constant 0 : index
    %5 = vector.load %arg3[%c0_4, %c0_5, %c0_6] : memref<7x1x128xf32, #tpu.memory_space<vmem>>, vector<1x1x128xf32>
    %6 = vector.shape_cast %5 : vector<1x1x128xf32> to vector<1x128xf32>
    %7 = vector.broadcast %6 : vector<1x128xf32> to vector<64x128xf32>
    %8 = arith.addf %4, %7 : vector<64x128xf32>
    %cst_7 = arith.constant 0.000000e+00 : f32
    %9 = vector.broadcast %cst_7 : f32 to vector<64x128xf32>
    %10 = arith.maximumf %8, %9 : vector<64x128xf32>
    %11 = arith.truncf %10 : vector<64x128xf32> to vector<64x128xbf16>
    %c1 = arith.constant 1 : index
    %c0_8 = arith.constant 0 : index
    %c0_9 = arith.constant 0 : index
    %12 = vector.load %arg2[%c1, %c0_8, %c0_9] : memref<7x128x128xbf16, #tpu.memory_space<vmem>>, vector<1x128x128xbf16>
    %13 = vector.shape_cast %12 : vector<1x128x128xbf16> to vector<128x128xbf16>
    %cst_10 = arith.constant dense<0.000000e+00> : vector<64x128xf32>
    %14 = tpu.matmul %11, %13, %cst_10 {dimension_numbers = #tpu.dot_dimension_numbers<[1], [0], [0], [1], [0, 0, 1, 1], [], []>} : vector<64x128xbf16>, vector<128x128xbf16>, vector<64x128xf32> -> vector<64x128xf32>
    %c1_11 = arith.constant 1 : index
    %c0_12 = arith.constant 0 : index
    %c0_13 = arith.constant 0 : index
    %15 = vector.load %arg3[%c1_11, %c0_12, %c0_13] : memref<7x1x128xf32, #tpu.memory_space<vmem>>, vector<1x1x128xf32>
    %16 = vector.shape_cast %15 : vector<1x1x128xf32> to vector<1x128xf32>
    %17 = vector.broadcast %16 : vector<1x128xf32> to vector<64x128xf32>
    %18 = arith.addf %14, %17 : vector<64x128xf32>
    %cst_14 = arith.constant 0.000000e+00 : f32
    %19 = vector.broadcast %cst_14 : f32 to vector<64x128xf32>
    %20 = arith.maximumf %18, %19 : vector<64x128xf32>
    %21 = arith.truncf %20 : vector<64x128xf32> to vector<64x128xbf16>
    %c2 = arith.constant 2 : index
    %c0_15 = arith.constant 0 : index
    %c0_16 = arith.constant 0 : index
    %22 = vector.load %arg2[%c2, %c0_15, %c0_16] : memref<7x128x128xbf16, #tpu.memory_space<vmem>>, vector<1x128x128xbf16>
    %23 = vector.shape_cast %22 : vector<1x128x128xbf16> to vector<128x128xbf16>
    %cst_17 = arith.constant dense<0.000000e+00> : vector<64x128xf32>
    %24 = tpu.matmul %21, %23, %cst_17 {dimension_numbers = #tpu.dot_dimension_numbers<[1], [0], [0], [1], [0, 0, 1, 1], [], []>} : vector<64x128xbf16>, vector<128x128xbf16>, vector<64x128xf32> -> vector<64x128xf32>
    %c2_18 = arith.constant 2 : index
    %c0_19 = arith.constant 0 : index
    %c0_20 = arith.constant 0 : index
    %25 = vector.load %arg3[%c2_18, %c0_19, %c0_20] : memref<7x1x128xf32, #tpu.memory_space<vmem>>, vector<1x1x128xf32>
    %26 = vector.shape_cast %25 : vector<1x1x128xf32> to vector<1x128xf32>
    %27 = vector.broadcast %26 : vector<1x128xf32> to vector<64x128xf32>
    %28 = arith.addf %24, %27 : vector<64x128xf32>
    %cst_21 = arith.constant 0.000000e+00 : f32
    %29 = vector.broadcast %cst_21 : f32 to vector<64x128xf32>
    %30 = arith.maximumf %28, %29 : vector<64x128xf32>
    %31 = arith.truncf %30 : vector<64x128xf32> to vector<64x128xbf16>
    %c3 = arith.constant 3 : index
    %c0_22 = arith.constant 0 : index
    %c0_23 = arith.constant 0 : index
    %32 = vector.load %arg2[%c3, %c0_22, %c0_23] : memref<7x128x128xbf16, #tpu.memory_space<vmem>>, vector<1x128x128xbf16>
    %33 = vector.shape_cast %32 : vector<1x128x128xbf16> to vector<128x128xbf16>
    %cst_24 = arith.constant dense<0.000000e+00> : vector<64x128xf32>
    %34 = tpu.matmul %31, %33, %cst_24 {dimension_numbers = #tpu.dot_dimension_numbers<[1], [0], [0], [1], [0, 0, 1, 1], [], []>} : vector<64x128xbf16>, vector<128x128xbf16>, vector<64x128xf32> -> vector<64x128xf32>
    %c3_25 = arith.constant 3 : index
    %c0_26 = arith.constant 0 : index
    %c0_27 = arith.constant 0 : index
    %35 = vector.load %arg3[%c3_25, %c0_26, %c0_27] : memref<7x1x128xf32, #tpu.memory_space<vmem>>, vector<1x1x128xf32>
    %36 = vector.shape_cast %35 : vector<1x1x128xf32> to vector<1x128xf32>
    %37 = vector.broadcast %36 : vector<1x128xf32> to vector<64x128xf32>
    %38 = arith.addf %34, %37 : vector<64x128xf32>
    %39 = arith.truncf %38 : vector<64x128xf32> to vector<64x128xbf16>
    %c4 = arith.constant 4 : index
    %c0_28 = arith.constant 0 : index
    %c0_29 = arith.constant 0 : index
    %40 = vector.load %arg2[%c4, %c0_28, %c0_29] : memref<7x128x128xbf16, #tpu.memory_space<vmem>>, vector<1x128x128xbf16>
    %41 = vector.shape_cast %40 : vector<1x128x128xbf16> to vector<128x128xbf16>
    %cst_30 = arith.constant dense<0.000000e+00> : vector<64x128xf32>
    %42 = tpu.matmul %39, %41, %cst_30 {dimension_numbers = #tpu.dot_dimension_numbers<[1], [0], [0], [1], [0, 0, 1, 1], [], []>} : vector<64x128xbf16>, vector<128x128xbf16>, vector<64x128xf32> -> vector<64x128xf32>
    %c4_31 = arith.constant 4 : index
    %c0_32 = arith.constant 0 : index
    %c0_33 = arith.constant 0 : index
    %43 = vector.load %arg3[%c4_31, %c0_32, %c0_33] : memref<7x1x128xf32, #tpu.memory_space<vmem>>, vector<1x1x128xf32>
    %44 = vector.shape_cast %43 : vector<1x1x128xf32> to vector<1x128xf32>
    %45 = vector.broadcast %44 : vector<1x128xf32> to vector<64x128xf32>
    %46 = arith.addf %42, %45 : vector<64x128xf32>
    %cst_34 = arith.constant 0.000000e+00 : f32
    %47 = vector.broadcast %cst_34 : f32 to vector<64x128xf32>
    %48 = arith.maximumf %46, %47 : vector<64x128xf32>
    %49 = arith.truncf %48 : vector<64x128xf32> to vector<64x128xbf16>
    %c5 = arith.constant 5 : index
    %c0_35 = arith.constant 0 : index
    %c0_36 = arith.constant 0 : index
    %50 = vector.load %arg2[%c5, %c0_35, %c0_36] : memref<7x128x128xbf16, #tpu.memory_space<vmem>>, vector<1x128x128xbf16>
    %51 = vector.shape_cast %50 : vector<1x128x128xbf16> to vector<128x128xbf16>
    %cst_37 = arith.constant dense<0.000000e+00> : vector<64x128xf32>
    %52 = tpu.matmul %49, %51, %cst_37 {dimension_numbers = #tpu.dot_dimension_numbers<[1], [0], [0], [1], [0, 0, 1, 1], [], []>} : vector<64x128xbf16>, vector<128x128xbf16>, vector<64x128xf32> -> vector<64x128xf32>
    %c5_38 = arith.constant 5 : index
    %c0_39 = arith.constant 0 : index
    %c0_40 = arith.constant 0 : index
    %53 = vector.load %arg3[%c5_38, %c0_39, %c0_40] : memref<7x1x128xf32, #tpu.memory_space<vmem>>, vector<1x1x128xf32>
    %54 = vector.shape_cast %53 : vector<1x1x128xf32> to vector<1x128xf32>
    %55 = vector.broadcast %54 : vector<1x128xf32> to vector<64x128xf32>
    %56 = arith.addf %52, %55 : vector<64x128xf32>
    %cst_41 = arith.constant 0.000000e+00 : f32
    %57 = vector.broadcast %cst_41 : f32 to vector<64x128xf32>
    %58 = arith.maximumf %56, %57 : vector<64x128xf32>
    %59 = arith.truncf %58 : vector<64x128xf32> to vector<64x128xbf16>
    %c6 = arith.constant 6 : index
    %c0_42 = arith.constant 0 : index
    %c0_43 = arith.constant 0 : index
    %60 = vector.load %arg2[%c6, %c0_42, %c0_43] : memref<7x128x128xbf16, #tpu.memory_space<vmem>>, vector<1x128x128xbf16>
    %61 = vector.shape_cast %60 : vector<1x128x128xbf16> to vector<128x128xbf16>
    %cst_44 = arith.constant dense<0.000000e+00> : vector<64x128xf32>
    %62 = tpu.matmul %59, %61, %cst_44 {dimension_numbers = #tpu.dot_dimension_numbers<[1], [0], [0], [1], [0, 0, 1, 1], [], []>} : vector<64x128xbf16>, vector<128x128xbf16>, vector<64x128xf32> -> vector<64x128xf32>
    %c6_45 = arith.constant 6 : index
    %c0_46 = arith.constant 0 : index
    %c0_47 = arith.constant 0 : index
    %63 = vector.load %arg3[%c6_45, %c0_46, %c0_47] : memref<7x1x128xf32, #tpu.memory_space<vmem>>, vector<1x1x128xf32>
    %64 = vector.shape_cast %63 : vector<1x1x128xf32> to vector<1x128xf32>
    %65 = vector.broadcast %64 : vector<1x128xf32> to vector<64x128xf32>
    %66 = arith.addf %62, %65 : vector<64x128xf32>
    %67 = vector.extract_strided_slice %66 {offsets = [0, 0], sizes = [64, 16], strides = [1, 1]} : vector<64x128xf32> to vector<64x16xf32>
    %c0_48 = arith.constant 0 : index
    %c0_49 = arith.constant 0 : index
    %68 = vector.load %arg4[%c0_48, %c0_49] : memref<64x16xf32, #tpu.memory_space<vmem>>, vector<64x16xf32>
    tpu.vector_store %arg4[%c0_48, %c0_49], %67 {strides = array<i32>} : memref<64x16xf32, #tpu.memory_space<vmem>>, vector<64x16xf32>,
    return
  }
  func.func @transform_0(%arg0: i32) -> (i32, i32) {
    %c0_i32 = arith.constant 0 : i32
    %c0_i32_0 = arith.constant 0 : i32
    return %arg0, %c0_i32 : i32, i32
  }
  func.func @transform_1(%arg0: i32) -> (i32, i32, i32) {
    %c0_i32 = arith.constant 0 : i32
    %c0_i32_0 = arith.constant 0 : i32
    %c0_i32_1 = arith.constant 0 : i32
    %c0_i32_2 = arith.constant 0 : i32
    return %c0_i32, %c0_i32_0, %c0_i32_1 : i32, i32, i32
  }
  func.func @transform_2(%arg0: i32) -> (i32, i32, i32) {
    %c0_i32 = arith.constant 0 : i32
    %c0_i32_0 = arith.constant 0 : i32
    %c0_i32_1 = arith.constant 0 : i32
    %c0_i32_2 = arith.constant 0 : i32
    return %c0_i32, %c0_i32_0, %c0_i32_1 : i32, i32, i32
  }
  func.func @transform_3(%arg0: i32) -> (i32, i32) {
    %c0_i32 = arith.constant 0 : i32
    %c0_i32_0 = arith.constant 0 : i32
    return %arg0, %c0_i32 : i32, i32
  }
}

</mosaic_0001>

<bundles_post_ra>
// kernel: tpu_custom_call.1
= control target key start
LH: loop header
LB: loop body
LE: loop exit
PB: predicated region body
PF: predicated region fallthrough
CT: control target
= control target key end

     0   :  { %8 = vsyncpa [#allocation3], 0  ;;  %s1718_s12 = smov 0   ;;  %s1796_s0 = inlined_call_operand.vmem [shape: f32[128,32], index: 0, kind: input, shape index: {}]   ;;  %s1797_s1 = inlined_call_operand.hbm [shape: bf16[7,128,128], index: 1, kind: input, shape index: {}]   ;;  %s1798_s2 = inlined_call_operand.vmem [shape: f32[7,1,128], index: 2, kind: input, shape index: {}]   ;;  %s1799_s3 = inlined_call_operand.vmem [shape: f32[128,16], index: 3, kind: output, shape index: {}]  }
   0x1 LB: > { %s1272_s13 = sadd.s32 4294967295, %s1693_s12   ;;  %p1274_p0 = scmp.ge.s32.totalorder %s1693_s12, 1  ;;  %s1693_s12 = sphi %s1718_s12, %s14_s12  }
   0x2   : > { %p113_p1 = scmp.lt.s32.totalorder %s1693_s12, 3  ;;  %s1695_s14 = smov [#allocation2]  }
   0x3   : > { %s125_s15 = sshll.u32 %s1695_s14, 4  ;;  %p1730_p3 = scmp.eq.s32.totalorder %s1272_s13, 0  ;;  %s126_s15 = int_to_ptr.vmem [resolvable:$true] %s125_s15 }
   0x4   : > { %p1726_p2 = pnand %p1274_p0, %p113_p1  ;;  %s1668_s18 = scalar_lea.vmem %s126_s15, 7168 }
   0x5   : > { %p1669_p7 = scmp.ne.s32.totalorder %s126_s15, %s1668_s18  ;;  %p1676_p10 = scmp.lt.s32.totalorder %s126_s15, %s126_s15 }
   0x6   : > { %p1590_p4 = pneg %p1726_p2  ;;  %p1677_p11 = scmp.lt.s32.totalorder %s1668_s18, %s1668_s18 }
   0x8   : > { %p1591_p5 = pnand %p1730_p3, %p1590_p4  ;;  %p1678_p12 = por %p1677_p11, %p1676_p10 }
   0xa   : > { %p1659_p6 = pneg %p1591_p5 }
   0xc   : > { %p1671_p8 = pnand %p1669_p7, %p1659_p6 }
   0xe   : > { %p1672_p9 = pneg %p1671_p8 }
  0x10   : > { %p1679_p13 = pnand %p1678_p12, %p1672_p9 }
  0x12   : > { %1682 = shalt.err (!%p1679_p13)
}
  0x13   : > { %s1696_s19 = smov 64   ;;  %s1697_s20 = smov 4  }
  0x14   : > { %1593 = dma.hbm_to_vmem [thread:$0]  (!%p1591_p5), %s1797_s1, 7168, %s126_s15, [#allocation3], %s1696_s19, %s1696_s19, %s1697_s20  }
  0x15   : > { %153 = sbr.rel (%p1726_p2) target bundleno = 1481 (0x5c9), region = 32 }
  0x1a   : > { %1688 = dma.done.wait (%p1730_p3), [#allocation3], 7168  }
  0x1b   : > { %1690 = vsyncadd (%p1730_p3), [#allocation3], 4294960128  ;;  %s1279_s23 = sshll.u32 %s1272_s13, 3  ;;  %v1607_v0 = vld [vmem:[#allocation2 + $0x8] sm:$0xff]   ;;  %v1608_v1 = vld [vmem:[#allocation2] sm:$0xff]   ;;  %vm225_vm0 = vcmask 261120  }
  0x1c   : > { %p178_p0 = scmp.lt.s32.totalorder %s1279_s23, 15  ;;  %1430 = vmatprep.subr.bf16.mxu0 %v1607_v0  ;;  %v1609_v9 = vld [vmem:[#allocation2 + $0x78] sm:$0xff]   ;;  %v1610_v11 = vld [vmem:[#allocation2 + $0x70] sm:$0xff]   ;;  %v1611_v15 = vld [vmem:[#allocation2 + $0x68] sm:$0xff]   ;;  %vm1195_vm1 = vcmask 130048  }
  0x1d   : > { %1431 = vmatpush3.bf16.msra.mxu0 %v1607_v0  ;;  %1442 = vmatprep.subr.bf16.mxu1 %v1609_v9  ;;  %v1612_v16 = vld [vmem:[#allocation2 + $0x60] sm:$0xff]   ;;  %v1613_v18 = vld [vmem:[#allocation2 + $0x58] sm:$0xff]   ;;  %v1614_v19 = vld [vmem:[#allocation2 + $0x50] sm:$0xff]  }
  0x1e   : > { %s1803_s23 = smov (!%p178_p0, %s1279_s23), 15  ;;  %1432 = vmatprep.subr.bf16.mxu0 %v1608_v1  ;;  %1443 = vmatpush3.bf16.msra.mxu1 %v1609_v9  ;;  %v1615_v20 = vld [vmem:[#allocation2 + $0x48] sm:$0xff]   ;;  %v1616_v21 = vld [vmem:[#allocation2 + $0x40] sm:$0xff]   ;;  %v1617_v22 = vld [vmem:[#allocation2 + $0xb8] sm:$0xff]  }
  0x1f   : > { %s1280_s24 = sshll.u32 %s1803_s23, 3  ;;  %1444 = vmatprep.subr.bf16.mxu1 %v1610_v11  ;;  %v1618_v23 = vld [vmem:[#allocation2 + $0xb0] sm:$0xff]   ;;  %v1619_v24 = vld [vmem:[#allocation2 + $0xa8] sm:$0xff]   ;;  %v1620_v25 = vld [vmem:[#allocation2 + $0xa0] sm:$0xff]  }
  0x20   : > { %s181_s27 = scalar_lea.vmem %s1796_s0, %s1280_s24  ;;  %v1621_v26 = vld [vmem:[#allocation2 + $0x98] sm:$0xff]   ;;  %v1283_v29 = vld [vmem:[%s1798_s2] ss:$0 sm:$0xff]  ;;  %v1622_v56 = vld [vmem:[#allocation2 + $0x90] sm:$0xff]   ;;  %s187_s18 = scalar_lea.vmem %s1799_s3, %s1280_s24 }
  0x21   : > { %v190_v2 = vld [vmem:[%s181_s27] sm:$0xff]  ;;  %v191_v3 = vld [vmem:[%s181_s27 + $0x8] sm:$0xff]  ;;  %v192_v5 = vld [vmem:[%s181_s27 + $0x10] sm:$0xff]  ;;  %1433 = vmatpush3.bf16.msra.mxu0 %v1608_v1 }
  0x22   : > { %v198_v4 = vpack.c.bf16 %v191_v3, %v190_v2  ;;  %v193_v6 = vld [vmem:[%s181_s27 + $0x18] sm:$0xff]  ;;  %v194_v7 = vld [vmem:[%s181_s27 + $0x20] sm:$0xff]  ;;  %v195_v8 = vld [vmem:[%s181_s27 + $0x28] sm:$0xff]  ;;  %1445 = vmatpush3.bf16.msra.mxu1 %v1610_v11  ;;  %1466 = vmatprep.subr.bf16.mxu0 %v1617_v22 }
  0x23   : > { %v199_v10 = vpack.c.bf16 %v193_v6, %v192_v5  ;;  %v200_v12 = vpack.c.bf16 %v195_v8, %v194_v7  ;;  %v196_v13 = vld [vmem:[%s181_s27 + $0x30] sm:$0xff]  ;;  %v197_v14 = vld [vmem:[%s181_s27 + $0x38] sm:$0xff]  ;;  %1446 = vmatprep.subr.bf16.mxu1 %v1611_v15  ;;  %v1623_v57 = vld [vmem:[#allocation2 + $0x88] sm:$0xff]  }
  0x24   : > { %1434 = vmatprep.mubr.msk.bf16.mxu0 %vm225_vm0, %v198_v4  ;;  %v201_v17 = vpack.c.bf16 %v197_v14, %v196_v13  ;;  %v1624_v58 = vld [vmem:[#allocation2 + $0x80] sm:$0xff]   ;;  %v1625_v59 = vld [vmem:[#allocation2 + $0xf8] sm:$0xff]   ;;  %v1626_v60 = vld [vmem:[#allocation2 + $0xf0] sm:$0xff]  }
  0x25   : > { %1435 = vmatmul.mubr.msk.bf16.vlgmr.msra.gmra.mxu0 %vm225_vm0, %v199_v10  ;;  %v1627_v61 = vld [vmem:[#allocation2 + $0xe8] sm:$0xff]   ;;  %v1628_v62 = vld [vmem:[#allocation2 + $0xe0] sm:$0xff]   ;;  %v1629_v63 = vld [vmem:[#allocation2 + $0xd8] sm:$0xff]  }
  0x26   : > { %1438 = vmatprep.mubr.msk.bf16.mxu0 %vm225_vm0, %v200_v12  ;;  %1447 = vmatpush3.bf16.msra.mxu1 %v1611_v15  ;;  %v1291_v2 = vld [vmem:[%s1798_s2 + $0x1] ss:$0 sm:$0xff] }
  0x27   : > { %1448 = vmatprep.subr.bf16.mxu1 %v1612_v16  ;;  %1467 = vmatpush3.bf16.msra.mxu0 %v1617_v22 }
  0x28   : > { %1468 = vmatprep.subr.bf16.mxu0 %v1618_v23 }
  0x2a   : > { %1449 = vmatpush3.bf16.msra.mxu1 %v1612_v16 }
  0x2b   : > { %1450 = vmatprep.subr.bf16.mxu1 %v1613_v18  ;;  %1469 = vmatpush3.bf16.msra.mxu0 %v1618_v23 }
  0x2c   : > { %1470 = vmatprep.subr.bf16.mxu0 %v1619_v24 }
  0x2d   : > { %1439 = vmatmul.mubr.msk.bf16.gmra.mxu0 %vm225_vm0, %v201_v17 }
  0x2e   : > { %1451 = vmatpush3.bf16.msra.mxu1 %v1613_v18 }
  0x2f   : > { %1452 = vmatprep.subr.bf16.mxu1 %v1614_v19  ;;  %1471 = vmatpush3.bf16.msra.mxu0 %v1619_v24 }
  0x30   : > { %1472 = vmatprep.subr.bf16.mxu0 %v1620_v25 }
  0x32   : > { %1453 = vmatpush3.bf16.msra.mxu1 %v1614_v19 }
  0x33   : > { %1454 = vmatprep.subr.bf16.mxu1 %v1615_v20  ;;  %1473 = vmatpush3.bf16.msra.mxu0 %v1620_v25 }
  0x34   : > { %1474 = vmatprep.subr.bf16.mxu0 %v1621_v26 }
  0x36   : > { %1455 = vmatpush3.bf16.msra.mxu1 %v1615_v20 }
  0x37   : > { %1456 = vmatprep.subr.bf16.mxu1 %v1616_v21  ;;  %1475 = vmatpush3.bf16.msra.mxu0 %v1621_v26 }
  0x38   : > { %1476 = vmatprep.subr.bf16.mxu0 %v1622_v56 }
  0x3a   : > { %1457 = vmatpush3.bf16.msra.mxu1 %v1616_v21 }
  0x3b   : > { %1477 = vmatpush3.bf16.msra.mxu0 %v1622_v56  ;;  %1490 = vmatprep.subr.bf16.mxu1 %v1625_v59 }
  0x3c   : > { %1478 = vmatprep.subr.bf16.mxu0 %v1623_v57 }
  0x3f   : > { %1479 = vmatpush3.bf16.msra.mxu0 %v1623_v57 }
  0x40   : > { %1480 = vmatprep.subr.bf16.mxu0 %v1624_v58 }
  0x43   : > { %1481 = vmatpush3.bf16.msra.mxu0 %v1624_v58 }
  0xe5   : > { %v1436_v27 = vpop.f32.mrf.mxu0 }
  0xe6   : > { %v281_v33 = vadd.f32 %v1436_v27, %v1283_v29 }
  0xe7   : > { %v272_v28 = vpop.f32.mrf.mxu0 }
  0xe8   : > { %v273_v31 = vadd.f32 %v1283_v29, %v272_v28  ;;  %v305_v40 = vmax.f32 %v281_v33, 0.0  ;;  %v1634_v33 = vld [vmem:[#allocation2 + $0x130] sm:$0xff]  }
  0xe9   : > { %v1437_v30 = vpop.f32.mrf.mxu0 }
  0xea   : > { %v284_v32 = vadd.f32 %v1437_v30, %v1283_v29  ;;  %v303_v38 = vmax.f32 %v273_v31, 0.0  ;;  %v1631_v30 = vld [vmem:[#allocation2 + $0xc8] sm:$0xff]   ;;  %v1632_v31 = vld [vmem:[#allocation2 + $0xc0] sm:$0xff]  }
  0xeb   : > { %v275_v34 = vpop.f32.mrf.mxu0 }
  0xec   : > { %v276_v35 = vadd.f32 %v1283_v29, %v275_v34  ;;  %v306_v36 = vmax.f32 %v284_v32, 0.0  ;;  %v1633_v32 = vld [vmem:[#allocation2 + $0x138] sm:$0xff]   ;;  %v1635_v34 = vld [vmem:[#allocation2 + $0x128] sm:$0xff]  }
  0xed   : > { %v1440_v37 = vpop.f32.mrf.mxu0  ;;  %1514 = vmatprep.subr.bf16.mxu0 %v1633_v32 }
  0xee   : > { %v304_v39 = vmax.f32 %v276_v35, 0.0  ;;  %v312_v43 = vpack.c.bf16 %v306_v36, %v305_v40  ;;  %v297_v47 = vadd.f32 %v1440_v37, %v1283_v29  ;;  %v1636_v35 = vld [vmem:[#allocation2 + $0x120] sm:$0xff]   ;;  %v1637_v36 = vld [vmem:[#allocation2 + $0x118] sm:$0xff]  }
  0xef   : > { %v288_v41 = vpop.f32.mrf.mxu0 }
  0xf0   : > { %v311_v42 = vpack.c.bf16 %v304_v39, %v303_v38  ;;  %v289_v45 = vadd.f32 %v1283_v29, %v288_v41  ;;  %v309_v53 = vmax.f32 %v297_v47, 0.0  ;;  %v1301_v39 = vld [vmem:[%s1798_s2 + $0x2] ss:$0 sm:$0xff] }
  0xf1   : > { %v1441_v44 = vpop.f32.mrf.mxu0 }
  0xf2   : > { %v300_v46 = vadd.f32 %v1441_v44, %v1283_v29  ;;  %1458 = vmatprep.mubr.bf16.mxu1 %v311_v42  ;;  %v307_v51 = vmax.f32 %v289_v45, 0.0 }
  0xf3   : > { %v291_v48 = vpop.f32.mrf.mxu0  ;;  %1459 = vmatmul.mubr.bf16.vlgmr.msra.gmra.mxu1 %v312_v43 }
  0xf4   : > { %v292_v49 = vadd.f32 %v1283_v29, %v291_v48  ;;  %v310_v50 = vmax.f32 %v300_v46, 0.0  ;;  %1491 = vmatpush3.bf16.msra.mxu1 %v1625_v59  ;;  %v1630_v29 = vld [vmem:[#allocation2 + $0xd0] sm:$0xff]  }
  0xf5   : > { %1492 = vmatprep.subr.bf16.mxu1 %v1626_v60 }
  0xf6   : > { %v308_v52 = vmax.f32 %v292_v49, 0.0  ;;  %v314_v55 = vpack.c.bf16 %v310_v50, %v309_v53 }
  0xf8   : > { %v313_v54 = vpack.c.bf16 %v308_v52, %v307_v51  ;;  %1493 = vmatpush3.bf16.msra.mxu1 %v1626_v60 }
  0xf9   : > { %1494 = vmatprep.subr.bf16.mxu1 %v1627_v61 }
  0xfa   : > { %1462 = vmatprep.mubr.bf16.mxu1 %v313_v54 }
  0xfb   : > { %1463 = vmatmul.mubr.bf16.gmra.mxu1 %v314_v55 }
  0xfc   : > { %1495 = vmatpush3.bf16.msra.mxu1 %v1627_v61 }
  0xfd   : > { %1496 = vmatprep.subr.bf16.mxu1 %v1628_v62 }
 0x100   : > { %1497 = vmatpush3.bf16.msra.mxu1 %v1628_v62 }
 0x101   : > { %1498 = vmatprep.subr.bf16.mxu1 %v1629_v63 }
 0x104   : > { %1499 = vmatpush3.bf16.msra.mxu1 %v1629_v63 }
 0x105   : > { %1500 = vmatprep.subr.bf16.mxu1 %v1630_v29 }
 0x108   : > { %1501 = vmatpush3.bf16.msra.mxu1 %v1630_v29 }
 0x109   : > { %1502 = vmatprep.subr.bf16.mxu1 %v1631_v30 }
 0x10c   : > { %1503 = vmatpush3.bf16.msra.mxu1 %v1631_v30 }
 0x10d   : > { %1504 = vmatprep.subr.bf16.mxu1 %v1632_v31 }
 0x110   : > { %1505 = vmatpush3.bf16.msra.mxu1 %v1632_v31  ;;  %v1646_v31 = vld [vmem:[#allocation2 + $0x150] sm:$0xff]  }
 0x1b3   : > { %v1460_v0 = vpop.f32.mrf.mxu1 }
 0x1b4   : > { %v431_v6 = vadd.f32 %v1460_v0, %v1291_v2 }
 0x1b5   : > { %v422_v1 = vpop.f32.mrf.mxu1 }
 0x1b6   : > { %v423_v4 = vadd.f32 %v1291_v2, %v422_v1  ;;  %v455_v13 = vmax.f32 %v431_v6, 0.0  ;;  %v1642_v6 = vld [vmem:[#allocation2 + $0x170] sm:$0xff]  }
 0x1b7   : > { %v1461_v3 = vpop.f32.mrf.mxu1 }
 0x1b8   : > { %v434_v5 = vadd.f32 %v1461_v3, %v1291_v2  ;;  %v453_v11 = vmax.f32 %v423_v4, 0.0  ;;  %v1639_v3 = vld [vmem:[#allocation2 + $0x108] sm:$0xff]   ;;  %v1640_v4 = vld [vmem:[#allocation2 + $0x100] sm:$0xff]  }
 0x1b9   : > { %v425_v7 = vpop.f32.mrf.mxu1 }
 0x1ba   : > { %v426_v8 = vadd.f32 %v1291_v2, %v425_v7  ;;  %v456_v9 = vmax.f32 %v434_v5, 0.0  ;;  %v1641_v5 = vld [vmem:[#allocation2 + $0x178] sm:$0xff]   ;;  %v1643_v7 = vld [vmem:[#allocation2 + $0x168] sm:$0xff]  }
 0x1bb   : > { %v1464_v10 = vpop.f32.mrf.mxu1  ;;  %1538 = vmatprep.subr.bf16.mxu1 %v1641_v5 }
 0x1bc   : > { %v454_v12 = vmax.f32 %v426_v8, 0.0  ;;  %v462_v16 = vpack.c.bf16 %v456_v9, %v455_v13  ;;  %v447_v20 = vadd.f32 %v1464_v10, %v1291_v2  ;;  %v1644_v8 = vld [vmem:[#allocation2 + $0x160] sm:$0xff]   ;;  %v1645_v9 = vld [vmem:[#allocation2 + $0x158] sm:$0xff]  }
 0x1bd   : > { %v438_v14 = vpop.f32.mrf.mxu1  ;;  %v1311_v13 = vld [vmem:[%s1798_s2 + $0x3] ss:$0 sm:$0xff] }
 0x1be   : > { %v461_v15 = vpack.c.bf16 %v454_v12, %v453_v11  ;;  %v439_v18 = vadd.f32 %v1291_v2, %v438_v14  ;;  %v459_v26 = vmax.f32 %v447_v20, 0.0 }
 0x1bf   : > { %v1465_v17 = vpop.f32.mrf.mxu1 }
 0x1c0   : > { %v450_v19 = vadd.f32 %v1465_v17, %v1291_v2  ;;  %1482 = vmatprep.mubr.bf16.mxu0 %v461_v15  ;;  %v457_v24 = vmax.f32 %v439_v18, 0.0 }
 0x1c1   : > { %v441_v21 = vpop.f32.mrf.mxu1  ;;  %1483 = vmatmul.mubr.bf16.vlgmr.msra.gmra.mxu0 %v462_v16 }
 0x1c2   : > { %v442_v22 = vadd.f32 %v1291_v2, %v441_v21  ;;  %v460_v23 = vmax.f32 %v450_v19, 0.0  ;;  %1515 = vmatpush3.bf16.msra.mxu0 %v1633_v32  ;;  %v1638_v2 = vld [vmem:[#allocation2 + $0x110] sm:$0xff]   ;;  %v1647_v32 = vld [vmem:[#allocation2 + $0x148] sm:$0xff]  }
 0x1c3   : > { %1516 = vmatprep.subr.bf16.mxu0 %v1634_v33 }
 0x1c4   : > { %v458_v25 = vmax.f32 %v442_v22, 0.0  ;;  %v464_v28 = vpack.c.bf16 %v460_v23, %v459_v26 }
 0x1c6   : > { %v463_v27 = vpack.c.bf16 %v458_v25, %v457_v24  ;;  %1517 = vmatpush3.bf16.msra.mxu0 %v1634_v33  ;;  %v1648_v33 = vld [vmem:[#allocation2 + $0x140] sm:$0xff]  }
 0x1c7   : > { %1518 = vmatprep.subr.bf16.mxu0 %v1635_v34 }
 0x1c8   : > { %1486 = vmatprep.mubr.bf16.mxu0 %v463_v27 }
 0x1c9   : > { %1487 = vmatmul.mubr.bf16.gmra.mxu0 %v464_v28 }
 0x1ca   : > { %1519 = vmatpush3.bf16.msra.mxu0 %v1635_v34  ;;  %v1649_v34 = vld [vmem:[#allocation2 + $0x1b8] sm:$0xff]  }
 0x1cb   : > { %1520 = vmatprep.subr.bf16.mxu0 %v1636_v35 }
 0x1ce   : > { %1521 = vmatpush3.bf16.msra.mxu0 %v1636_v35  ;;  %v1650_v35 = vld [vmem:[#allocation2 + $0x1b0] sm:$0xff]  }
 0x1cf   : > { %1522 = vmatprep.subr.bf16.mxu0 %v1637_v36 }
 0x1d2   : > { %1523 = vmatpush3.bf16.msra.mxu0 %v1637_v36  ;;  %v1651_v36 = vld [vmem:[#allocation2 + $0x1a8] sm:$0xff]  }
 0x1d3   : > { %1524 = vmatprep.subr.bf16.mxu0 %v1638_v2 }
 0x1d6   : > { %1525 = vmatpush3.bf16.msra.mxu0 %v1638_v2 }
 0x1d7   : > { %1526 = vmatprep.subr.bf16.mxu0 %v1639_v3 }
 0x1da   : > { %1527 = vmatpush3.bf16.msra.mxu0 %v1639_v3 }
 0x1db   : > { %1528 = vmatprep.subr.bf16.mxu0 %v1640_v4 }
 0x1de   : > { %1529 = vmatpush3.bf16.msra.mxu0 %v1640_v4  ;;  %v1654_v4 = vld [vmem:[#allocation2 + $0x190] sm:$0xff]  }
 0x1df   : > { %1562 = vmatprep.subr.bf16.mxu0 %v1649_v34 }
 0x281   : > { %v1484_v37 = vpop.f32.mrf.mxu0 }
 0x282   : > { %v581_v43 = vadd.f32 %v1484_v37, %v1301_v39  ;;  %v1652_v37 = vld [vmem:[#allocation2 + $0x1a0] sm:$0xff]  }
 0x283   : > { %v572_v38 = vpop.f32.mrf.mxu0 }
 0x284   : > { %v573_v41 = vadd.f32 %v1301_v39, %v572_v38  ;;  %v605_v50 = vmax.f32 %v581_v43, 0.0  ;;  %v1653_v38 = vld [vmem:[#allocation2 + $0x198] sm:$0xff]  }
 0x285   : > { %v1485_v40 = vpop.f32.mrf.mxu0 }
 0x286   : > { %v584_v42 = vadd.f32 %v1485_v40, %v1301_v39  ;;  %v603_v48 = vmax.f32 %v573_v41, 0.0  ;;  %v1321_v41 = vld [vmem:[%s1798_s2 + $0x4] ss:$0 sm:$0xff] }
 0x287   : > { %v575_v44 = vpop.f32.mrf.mxu0 }
 0x288   : > { %v576_v45 = vadd.f32 %v1301_v39, %v575_v44  ;;  %v606_v46 = vmax.f32 %v584_v42, 0.0 }
 0x289   : > { %v1488_v47 = vpop.f32.mrf.mxu0 }
 0x28a   : > { %v604_v49 = vmax.f32 %v576_v45, 0.0  ;;  %v612_v53 = vpack.c.bf16 %v606_v46, %v605_v50  ;;  %v597_v57 = vadd.f32 %v1488_v47, %v1301_v39 }
 0x28b   : > { %v588_v51 = vpop.f32.mrf.mxu0 }
 0x28c   : > { %v611_v52 = vpack.c.bf16 %v604_v49, %v603_v48  ;;  %v589_v55 = vadd.f32 %v1301_v39, %v588_v51  ;;  %v609_v63 = vmax.f32 %v597_v57, 0.0 }
 0x28d   : > { %v1489_v54 = vpop.f32.mrf.mxu0 }
 0x28e   : > { %v600_v56 = vadd.f32 %v1489_v54, %v1301_v39  ;;  %1506 = vmatprep.mubr.bf16.mxu1 %v611_v52  ;;  %v607_v61 = vmax.f32 %v589_v55, 0.0 }
 0x28f   : > { %v591_v58 = vpop.f32.mrf.mxu0  ;;  %1507 = vmatmul.mubr.bf16.vlgmr.msra.gmra.mxu1 %v612_v53 }
 0x290   : > { %v592_v59 = vadd.f32 %v1301_v39, %v591_v58  ;;  %v610_v60 = vmax.f32 %v600_v56, 0.0  ;;  %1539 = vmatpush3.bf16.msra.mxu1 %v1641_v5  ;;  %v1655_v5 = vld [vmem:[#allocation2 + $0x188] sm:$0xff]  }
 0x291   : > { %1540 = vmatprep.subr.bf16.mxu1 %v1642_v6 }
 0x292   : > { %v608_v62 = vmax.f32 %v592_v59, 0.0  ;;  %v614_v1 = vpack.c.bf16 %v610_v60, %v609_v63 }
 0x294   : > { %v613_v0 = vpack.c.bf16 %v608_v62, %v607_v61  ;;  %1541 = vmatpush3.bf16.msra.mxu1 %v1642_v6  ;;  %v1656_v6 = vld [vmem:[#allocation2 + $0x180] sm:$0xff]  }
 0x295   : > { %1542 = vmatprep.subr.bf16.mxu1 %v1643_v7 }
 0x296   : > { %1510 = vmatprep.mubr.bf16.mxu1 %v613_v0 }
 0x297   : > { %1511 = vmatmul.mubr.bf16.gmra.mxu1 %v614_v1 }
 0x298   : > { %1543 = vmatpush3.bf16.msra.mxu1 %v1643_v7 }
 0x299   : > { %1544 = vmatprep.subr.bf16.mxu1 %v1644_v8 }
 0x29c   : > { %1545 = vmatpush3.bf16.msra.mxu1 %v1644_v8 }
 0x29d   : > { %1546 = vmatprep.subr.bf16.mxu1 %v1645_v9 }
 0x2a0   : > { %1547 = vmatpush3.bf16.msra.mxu1 %v1645_v9  ;;  %v1331_v9 = vld [vmem:[%s1798_s2 + $0x5] ss:$0 sm:$0xff] }
 0x2a1   : > { %1548 = vmatprep.subr.bf16.mxu1 %v1646_v31 }
 0x2a4   : > { %1549 = vmatpush3.bf16.msra.mxu1 %v1646_v31 }
 0x2a5   : > { %1550 = vmatprep.subr.bf16.mxu1 %v1647_v32 }
 0x2a8   : > { %1551 = vmatpush3.bf16.msra.mxu1 %v1647_v32 }
 0x2a9   : > { %1552 = vmatprep.subr.bf16.mxu1 %v1648_v33 }
 0x2ac   : > { %1553 = vmatpush3.bf16.msra.mxu1 %v1648_v33 }
 0x34f   : > { %v1508_v10 = vpop.f32.mrf.mxu1 }
 0x350   : > { %v731_v18 = vadd.f32 %v1508_v10, %v1311_v13 }
 0x351   : > { %v722_v11 = vpop.f32.mrf.mxu1 }
 0x352   : > { %v723_v16 = vadd.f32 %v1311_v13, %v722_v11 }
 0x353   : > { %v1509_v12 = vpop.f32.mrf.mxu1 }
 0x354   : > { %v734_v14 = vadd.f32 %v1509_v12, %v1311_v13 }
 0x355   : > { %v725_v15 = vpop.f32.mrf.mxu1 }
 0x356   : > { %v726_v17 = vadd.f32 %v1311_v13, %v725_v15  ;;  %v754_v21 = vpack.c.bf16 %v734_v14, %v731_v18 }
 0x357   : > { %v1512_v19 = vpop.f32.mrf.mxu1 }
 0x358   : > { %v753_v20 = vpack.c.bf16 %v726_v17, %v723_v16  ;;  %v747_v28 = vadd.f32 %v1512_v19, %v1311_v13 }
 0x359   : > { %v738_v22 = vpop.f32.mrf.mxu1 }
 0x35a   : > { %1530 = vmatprep.mubr.bf16.mxu0 %v753_v20  ;;  %v739_v26 = vadd.f32 %v1311_v13, %v738_v22 }
 0x35b   : > { %v1513_v23 = vpop.f32.mrf.mxu1  ;;  %1531 = vmatmul.mubr.bf16.vlgmr.msra.gmra.mxu0 %v754_v21 }
 0x35c   : > { %v750_v24 = vadd.f32 %v1513_v23, %v1311_v13  ;;  %1563 = vmatpush3.bf16.msra.mxu0 %v1649_v34 }
 0x35d   : > { %v741_v25 = vpop.f32.mrf.mxu1  ;;  %1564 = vmatprep.subr.bf16.mxu0 %v1650_v35 }
 0x35e   : > { %v742_v27 = vadd.f32 %v1311_v13, %v741_v25  ;;  %v756_v30 = vpack.c.bf16 %v750_v24, %v747_v28 }
 0x360   : > { %v755_v29 = vpack.c.bf16 %v742_v27, %v739_v26  ;;  %1565 = vmatpush3.bf16.msra.mxu0 %v1650_v35 }
 0x361   : > { %1566 = vmatprep.subr.bf16.mxu0 %v1651_v36 }
 0x362   : > { %1534 = vmatprep.mubr.bf16.mxu0 %v755_v29 }
 0x363   : > { %1535 = vmatmul.mubr.bf16.gmra.mxu0 %v756_v30 }
 0x364   : > { %1567 = vmatpush3.bf16.msra.mxu0 %v1651_v36  ;;  %v1341_v36 = vld [vmem:[%s1798_s2 + $0x6] ss:$0 sm:$0xff] }
 0x365   : > { %1568 = vmatprep.subr.bf16.mxu0 %v1652_v37 }
 0x368   : > { %1569 = vmatpush3.bf16.msra.mxu0 %v1652_v37 }
 0x369   : > { %1570 = vmatprep.subr.bf16.mxu0 %v1653_v38 }
 0x36c   : > { %1571 = vmatpush3.bf16.msra.mxu0 %v1653_v38 }
 0x36d   : > { %1572 = vmatprep.subr.bf16.mxu0 %v1654_v4 }
 0x370   : > { %1573 = vmatpush3.bf16.msra.mxu0 %v1654_v4 }
 0x371   : > { %1574 = vmatprep.subr.bf16.mxu0 %v1655_v5 }
 0x374   : > { %1575 = vmatpush3.bf16.msra.mxu0 %v1655_v5 }
 0x375   : > { %1576 = vmatprep.subr.bf16.mxu0 %v1656_v6 }
 0x378   : > { %1577 = vmatpush3.bf16.msra.mxu0 %v1656_v6 }
 0x41b   : > { %v1532_v39 = vpop.f32.mrf.mxu0 }
 0x41c   : > { %v873_v45 = vadd.f32 %v1532_v39, %v1321_v41 }
 0x41d   : > { %v864_v40 = vpop.f32.mrf.mxu0 }
 0x41e   : > { %v865_v43 = vadd.f32 %v1321_v41, %v864_v40  ;;  %v897_v52 = vmax.f32 %v873_v45, 0.0 }
 0x41f   : > { %v1533_v42 = vpop.f32.mrf.mxu0 }
 0x420   : > { %v876_v44 = vadd.f32 %v1533_v42, %v1321_v41  ;;  %v895_v50 = vmax.f32 %v865_v43, 0.0 }
 0x421   : > { %v867_v46 = vpop.f32.mrf.mxu0 }
 0x422   : > { %v868_v47 = vadd.f32 %v1321_v41, %v867_v46  ;;  %v898_v48 = vmax.f32 %v876_v44, 0.0 }
 0x423   : > { %v1536_v49 = vpop.f32.mrf.mxu0 }
 0x424   : > { %v896_v51 = vmax.f32 %v868_v47, 0.0  ;;  %v904_v55 = vpack.c.bf16 %v898_v48, %v897_v52  ;;  %v889_v59 = vadd.f32 %v1536_v49, %v1321_v41 }
 0x425   : > { %v880_v53 = vpop.f32.mrf.mxu0 }
 0x426   : > { %v903_v54 = vpack.c.bf16 %v896_v51, %v895_v50  ;;  %v881_v57 = vadd.f32 %v1321_v41, %v880_v53  ;;  %v901_v1 = vmax.f32 %v889_v59, 0.0 }
 0x427   : > { %v1537_v56 = vpop.f32.mrf.mxu0 }
 0x428   : > { %v892_v58 = vadd.f32 %v1537_v56, %v1321_v41  ;;  %1554 = vmatprep.mubr.bf16.mxu1 %v903_v54  ;;  %v899_v63 = vmax.f32 %v881_v57, 0.0 }
 0x429   : > { %v883_v60 = vpop.f32.mrf.mxu0  ;;  %1555 = vmatmul.mubr.bf16.vlgmr.msra.gmra.mxu1 %v904_v55 }
 0x42a   : > { %v884_v61 = vadd.f32 %v1321_v41, %v883_v60  ;;  %v902_v62 = vmax.f32 %v892_v58, 0.0 }
 0x42c   : > { %v900_v0 = vmax.f32 %v884_v61, 0.0  ;;  %v906_v3 = vpack.c.bf16 %v902_v62, %v901_v1 }
 0x42e   : > { %v905_v2 = vpack.c.bf16 %v900_v0, %v899_v63 }
 0x430   : > { %1558 = vmatprep.mubr.bf16.mxu1 %v905_v2 }
 0x431   : > { %1559 = vmatmul.mubr.bf16.gmra.mxu1 %v906_v3 }
 0x4e9   : > { %v1556_v7 = vpop.f32.mrf.mxu1 }
 0x4ea   : > { %v1023_v13 = vadd.f32 %v1556_v7, %v1331_v9 }
 0x4eb   : > { %v1014_v8 = vpop.f32.mrf.mxu1 }
 0x4ec   : > { %v1015_v11 = vadd.f32 %v1331_v9, %v1014_v8  ;;  %v1047_v20 = vmax.f32 %v1023_v13, 0.0 }
 0x4ed   : > { %v1557_v10 = vpop.f32.mrf.mxu1 }
 0x4ee   : > { %v1026_v12 = vadd.f32 %v1557_v10, %v1331_v9  ;;  %v1045_v18 = vmax.f32 %v1015_v11, 0.0 }
 0x4ef   : > { %v1017_v14 = vpop.f32.mrf.mxu1 }
 0x4f0   : > { %v1018_v15 = vadd.f32 %v1331_v9, %v1017_v14  ;;  %v1048_v16 = vmax.f32 %v1026_v12, 0.0 }
 0x4f1   : > { %v1560_v17 = vpop.f32.mrf.mxu1 }
 0x4f2   : > { %v1046_v19 = vmax.f32 %v1018_v15, 0.0  ;;  %v1054_v23 = vpack.c.bf16 %v1048_v16, %v1047_v20  ;;  %v1039_v27 = vadd.f32 %v1560_v17, %v1331_v9 }
 0x4f3   : > { %v1030_v21 = vpop.f32.mrf.mxu1 }
 0x4f4   : > { %v1053_v22 = vpack.c.bf16 %v1046_v19, %v1045_v18  ;;  %v1031_v25 = vadd.f32 %v1331_v9, %v1030_v21  ;;  %v1051_v33 = vmax.f32 %v1039_v27, 0.0 }
 0x4f5   : > { %v1561_v24 = vpop.f32.mrf.mxu1 }
 0x4f6   : > { %v1042_v26 = vadd.f32 %v1561_v24, %v1331_v9  ;;  %1578 = vmatprep.mubr.bf16.mxu0 %v1053_v22  ;;  %v1049_v31 = vmax.f32 %v1031_v25, 0.0 }
 0x4f7   : > { %v1033_v28 = vpop.f32.mrf.mxu1  ;;  %1579 = vmatmul.mubr.bf16.vlgmr.msra.gmra.mxu0 %v1054_v23 }
 0x4f8   : > { %v1034_v29 = vadd.f32 %v1331_v9, %v1033_v28  ;;  %v1052_v30 = vmax.f32 %v1042_v26, 0.0 }
 0x4fa   : > { %v1050_v32 = vmax.f32 %v1034_v29, 0.0  ;;  %v1056_v35 = vpack.c.bf16 %v1052_v30, %v1051_v33 }
 0x4fc   : > { %v1055_v34 = vpack.c.bf16 %v1050_v32, %v1049_v31 }
 0x4fe   : > { %1582 = vmatprep.mubr.bf16.mxu0 %v1055_v34 }
 0x4ff   : > { %1583 = vmatmul.mubr.bf16.gmra.mxu0 %v1056_v35 }
 0x5b7   : > { %v1580_v37 = vpop.f32.mrf.mxu0 }
 0x5b8   : > { %v1173_v38 = vadd.f32 %v1580_v37, %v1341_v36 }
 0x5b9   : > { %v1164_v39 = vpop.f32.mrf.mxu0 }
 0x5ba   : > { %1198 = vst.msk [vmem:[%s187_s18 + $0x10] sm:$0xff] %vm1195_vm1, %v1173_v38  ;;  %v1165_v40 = vadd.f32 %v1341_v36, %v1164_v39 }
 0x5bb   : > { %v1581_v41 = vpop.f32.mrf.mxu0 }
 0x5bc   : > { %1196 = vst.msk [vmem:[%s187_s18] sm:$0xff] %vm1195_vm1, %v1165_v40  ;;  %v1176_v42 = vadd.f32 %v1581_v41, %v1341_v36 }
 0x5bd   : > { %v1167_v43 = vpop.f32.mrf.mxu0 }
 0x5be   : > { %1199 = vst.msk [vmem:[%s187_s18 + $0x18] sm:$0xff] %vm1195_vm1, %v1176_v42  ;;  %v1168_v44 = vadd.f32 %v1341_v36, %v1167_v43 }
 0x5bf   : > { %v1584_v45 = vpop.f32.mrf.mxu0 }
 0x5c0   : > { %1197 = vst.msk [vmem:[%s187_s18 + $0x8] sm:$0xff] %vm1195_vm1, %v1168_v44  ;;  %v1189_v46 = vadd.f32 %v1584_v45, %v1341_v36 }
 0x5c1   : > { %v1180_v47 = vpop.f32.mrf.mxu0 }
 0x5c2   : > { %1202 = vst.msk [vmem:[%s187_s18 + $0x30] sm:$0xff] %vm1195_vm1, %v1189_v46  ;;  %v1181_v48 = vadd.f32 %v1341_v36, %v1180_v47 }
 0x5c3   : > { %v1585_v49 = vpop.f32.mrf.mxu0 }
 0x5c4   : > { %1200 = vst.msk [vmem:[%s187_s18 + $0x20] sm:$0xff] %vm1195_vm1, %v1181_v48  ;;  %v1192_v50 = vadd.f32 %v1585_v49, %v1341_v36 }
 0x5c5   : > { %v1183_v51 = vpop.f32.mrf.mxu0 }
 0x5c6   : > { %1203 = vst.msk [vmem:[%s187_s18 + $0x38] sm:$0xff] %vm1195_vm1, %v1192_v50  ;;  %v1184_v52 = vadd.f32 %v1341_v36, %v1183_v51 }
 0x5c8   : > { %1201 = vst.msk [vmem:[%s187_s18 + $0x28] sm:$0xff] %vm1195_vm1, %v1184_v52 }
 0x5c9 PF: > { %s14_s12 = sadd.s32 1, %s1693_s12  }
 0x5ca   : > { %p11_p1 = scmp.ge.s32.totalorder %s14_s12, 4  }
 0x5cc   :  { %13 = sbr.rel (!%p11_p1) target bundleno = 1 (0x1), region = 79 }
 0x5d1   :  { %1226 = vsyncpa [#allocation3], 1 }
 0x5d2   :  { %1228 = vsyncpa [#allocation3 + $0x1], 1 }

</bundles_post_ra>
